<compile_context>
chip_gen: v7x
topology: tpu7x:2x2x1
jax: 0.10.0
libtpu: 0.0.40
codegen_flags: <defaults>
</compile_context>

<pallas_src>
import math

import jax
import jax.numpy as jnp
from jax.experimental import pallas as pl
from jax.experimental.pallas import tpu as pltpu

_LANE = 128
# Safe on every generation: v7x has 64 MiB physical VMEM per TC, v5e/v6e 128 MiB.
# Actual usage is a few MiB (independent of N) after the K-axis tiling below.
_VMEM_LIMIT = 48 * 1024 * 1024


def _round_up(x, m):
    return ((x + m - 1) // m) * m


def _pow2_floor_clamp(v, lo, hi):
    """Largest power of two <= min(v, hi), but at least lo (lo, hi powers of 2)."""
    v = max(int(lo), min(int(v), int(hi)))
    p = int(lo)
    while p * 2 <= v:
        p *= 2
    return p


def _pad2(x, rows, cols):
    return jnp.pad(x, ((0, rows - x.shape[0]), (0, cols - x.shape[1])))


def _make_layer1_kernel(n_valid, tm, tk):
    """Layer-1 + pool accumulation kernel over a (row-tile, K-tile) grid."""

    def kernel(a_ref, xw1_ref, st_ref, b1_ref, w2_ref, p_ref, sa_ref, acc_ref):
        i = pl.program_id(0)          # node row tile
        k = pl.program_id(1)          # node column (contraction) tile
        k_last = pl.num_programs(1) - 1

        # Zero the SA accumulator once, at the very first grid step.
        @pl.when((i == 0) & (k == 0))
        def _():
            sa_ref[...] = jnp.zeros_like(sa_ref)

        # Zero the per-row-tile aggregate at the start of each K sweep.
        @pl.when(k == 0)
        def _():
            acc_ref[...] = jnp.zeros_like(acc_ref)

        # Aggregate: A tile [tm, tk] (bf16) @ XW1 tile [tk, H_p] (bf16), f32 accum.
        acc_ref[...] += jnp.dot(a_ref[...], xw1_ref[...],
                                preferred_element_type=jnp.float32)

        # Pool accumulation: SA[:, k-cols] += S^T_tile^T @ A_tile (contract the
        # node-row axis; same A tile, so A is never re-read for the pool).
        col = pl.multiple_of(k * tk, tk)
        sa_part = jax.lax.dot_general(
            st_ref[...].astype(jnp.bfloat16), a_ref[...],
            dimension_numbers=(((0,), (0,)), ((), ())),
            preferred_element_type=jnp.float32)
        sa_ref[:, pl.ds(col, tk)] = sa_ref[:, pl.ds(col, tk)] + sa_part

        # Finalize this row tile once the contraction over node columns is done:
        # H1 = relu(agg + b1); mask padded rows; P = H1 @ W2 (bf16 to HBM).
        @pl.when(k == k_last)
        def _():
            h = jnp.maximum(acc_ref[...] + b1_ref[...], 0.0)
            row = jax.lax.broadcasted_iota(jnp.int32, h.shape, 0) + i * tm
            h = jnp.where(row < n_valid, h, 0.0)   # zero padded node rows
            p = jnp.dot(h.astype(jnp.bfloat16), w2_ref[...],
                        preferred_element_type=jnp.float32)
            p_ref[...] = p.astype(p_ref.dtype)

    return kernel


def _pool_project_kernel(sa_ref, p_ref, b2_ref, out_ref):
    """out = relu(SA @ P + b2), K-tiled over nodes, accumulated in out_ref."""
    k = pl.program_id(0)

    @pl.when(k == 0)
    def _():
        out_ref[...] = jnp.zeros_like(out_ref)

    out_ref[...] += jnp.dot(sa_ref[...].astype(jnp.bfloat16), p_ref[...],
                            preferred_element_type=jnp.float32)

    @pl.when(k == pl.num_programs(0) - 1)
    def _():
        out_ref[...] = jnp.maximum(out_ref[...] + b2_ref[...], 0.0)


def prepare_gcn_operands(a_norm, x, w1, b1, w2, b2, s, *, tm=512, tk=512):
    """Pad / cast / pre-project operands.  Call ONCE per graph batch.

    a_norm: [N, N] symmetrically-normalized adjacency, x: [N, Fin],
    w1: [Fin, H], b1: [H], w2: [H, C], b2: [C],
    s: [B, N] mean-pool matrix (row b = 1/n_b on graph b's nodes).
    """
    n, _ = x.shape
    h_feats = w1.shape[1]
    num_classes = w2.shape[1]
    num_graphs = s.shape[0]

    f32, bf16 = jnp.float32, jnp.bfloat16

    h_p = _round_up(h_feats, _LANE)
    c_p = _round_up(num_classes, _LANE)
    b_pad = _round_up(num_graphs, 8)

    # Power-of-two tiles so tm | n_p and tk | n_p are both guaranteed.
    tk = _pow2_floor_clamp(tk, 128, pl.next_power_of_2(_round_up(n, 128)))
    tm = _pow2_floor_clamp(tm, 8, pl.next_power_of_2(_round_up(n, 8)))
    n_p = _round_up(n, max(tm, tk))

    a_p = _pad2(a_norm.astype(f32), n_p, n_p).astype(bf16)
    xw1 = x.astype(f32) @ w1.astype(f32)                  # pre-project X @ W1 once
    xw1_p = _pad2(xw1, n_p, h_p).astype(bf16)
    w2_p = _pad2(w2.astype(f32), h_p, c_p).astype(bf16)
    b1_p = _pad2(b1.reshape(1, -1).astype(f32), 1, h_p)
    b2_p = _pad2(b2.reshape(1, -1).astype(f32), 1, c_p)
    st_p = _pad2(s.astype(f32).T, n_p, b_pad)             # [N_p, B_pad]

    meta = dict(n=n, n_p=n_p, tm=tm, tk=tk, h_p=h_p, c_p=c_p, b_pad=b_pad,
                num_graphs=num_graphs, num_classes=num_classes)
    return (a_p, xw1_p, st_p, b1_p, w2_p, b2_p), meta


def gcn_forward_prepared(operands, meta):
    """Hot path: two pallas_calls; the N x N adjacency is read exactly once."""
    a_p, xw1_p, st_p, b1_p, w2_p, b2_p = operands
    n, n_p, tm, tk = meta["n"], meta["n_p"], meta["tm"], meta["tk"]
    h_p, c_p, b_pad = meta["h_p"], meta["c_p"], meta["b_pad"]

    n_tiles = n_p // tm
    k_tiles = n_p // tk
    bf16, f32 = jnp.bfloat16, jnp.float32

    # ---- Pass 1: P = relu(A XW1 + b1) @ W2, and SA = S @ A (fused pool) ------
    p, sa = pl.pallas_call(
        _make_layer1_kernel(n, tm, tk),
        out_shape=(jax.ShapeDtypeStruct((n_p, c_p), bf16),
                   jax.ShapeDtypeStruct((b_pad, n_p), f32)),
        grid_spec=pltpu.PrefetchScalarGridSpec(
            num_scalar_prefetch=0,
            grid=(n_tiles, k_tiles),
            in_specs=[
                pl.BlockSpec((tm, tk), lambda i, k: (i, k)),       # A tile (streamed)
                pl.BlockSpec((tk, h_p), lambda i, k: (k, 0)),      # XW1 K tile
                pl.BlockSpec((tm, b_pad), lambda i, k: (i, 0)),    # S^T row tile
                pl.BlockSpec((1, h_p), lambda i, k: (0, 0)),       # b1 (resident)
                pl.BlockSpec((h_p, c_p), lambda i, k: (0, 0)),     # W2 (resident)
            ],
            out_specs=[
                pl.BlockSpec((tm, c_p), lambda i, k: (i, 0)),      # P row tiles
                pl.BlockSpec((b_pad, n_p), lambda i, k: (0, 0)),   # SA accumulator
            ],
            scratch_shapes=[pltpu.VMEM((tm, h_p), f32)],           # agg accumulator
        ),
        compiler_params=pltpu.CompilerParams(
            # Both axes MUST be "arbitrary": the SA output and the (tm, h_p)
            # aggregate are carried across grid steps (breaks under megacore).
            dimension_semantics=("arbitrary", "arbitrary"),
            vmem_limit_bytes=_VMEM_LIMIT),
    )(a_p, xw1_p, st_p, b1_p, w2_p)

    # ---- Pass 2 (tiny, no A): out = relu(SA @ P + b2) ------------------------
    out = pl.pallas_call(
        _pool_project_kernel,
        out_shape=jax.ShapeDtypeStruct((b_pad, c_p), f32),
        grid_spec=pltpu.PrefetchScalarGridSpec(
            num_scalar_prefetch=0,
            grid=(k_tiles,),
            in_specs=[
                pl.BlockSpec((b_pad, tk), lambda k: (0, k)),   # SA K tile
                pl.BlockSpec((tk, c_p), lambda k: (k, 0)),     # P K tile
                pl.BlockSpec((1, c_p), lambda k: (0, 0)),      # b2
            ],
            out_specs=pl.BlockSpec((b_pad, c_p), lambda k: (0, 0)),
        ),
        compiler_params=pltpu.CompilerParams(
            dimension_semantics=("arbitrary",),                # reduction axis
            vmem_limit_bytes=_VMEM_LIMIT),
    )(sa, p, b2_p)

    return out[:meta["num_graphs"], :meta["num_classes"]]


def gcn_forward(a_norm, x, w1, b1, w2, b2, s, *, tm=512, tk=512):
    """Convenience wrapper (prefer hoisting prepare_gcn_operands out of the loop)."""
    ops, meta = prepare_gcn_operands(a_norm, x, w1, b1, w2, b2, s, tm=tm, tk=tk)
    return gcn_forward_prepared(ops, meta)


def _symmetric_norm(adj):
    # D^{-1/2} A D^{-1/2} (DGL GraphConv norm='both'), zero-degree guarded.
    deg = jnp.sum(adj, axis=1)
    inv_sqrt = jnp.where(deg > 0, jax.lax.rsqrt(jnp.maximum(deg, 1e-12)), 0.0)
    return adj * inv_sqrt[:, None] * inv_sqrt[None, :]


if __name__ == "__main__":
    # 4 graphs of 40 nodes each: N=160 -> padded to 256; in=8, hidden=32, classes=4.
    NUM_GRAPHS, NODES_PER_GRAPH = 4, 40
    N = NUM_GRAPHS * NODES_PER_GRAPH
    IN_FEATS, H_FEATS, NUM_CLASSES = 8, 32, 4

    key = jax.random.PRNGKey(0)
    k_x, k_w1, k_b1, k_w2, k_b2 = jax.random.split(key, 5)

    # Per-graph undirected ring adjacency; batch = block-diagonal via kron.
    eye_m = jnp.eye(NODES_PER_GRAPH, dtype=jnp.float32)
    ring = jnp.roll(eye_m, 1, axis=1) + jnp.roll(eye_m, -1, axis=1)
    adj = jnp.kron(jnp.eye(NUM_GRAPHS, dtype=jnp.float32), ring)
    a_norm = _symmetric_norm(adj)

    # Graph mean-pool matrix S: [B, N], row g = 1/n_g over graph g's nodes.
    s = jnp.kron(jnp.eye(NUM_GRAPHS, dtype=jnp.float32),
                 jnp.full((1, NODES_PER_GRAPH), 1.0 / NODES_PER_GRAPH, jnp.float32))

    x = jax.random.normal(k_x, (N, IN_FEATS), dtype=jnp.float32)

    def xavier_uniform(k, fan_in, fan_out):
        limit = math.sqrt(6.0 / (fan_in + fan_out))
        return jax.random.uniform(k, (fan_in, fan_out), jnp.float32, -limit, limit)

    w1 = xavier_uniform(k_w1, IN_FEATS, H_FEATS)
    b1 = 0.05 * jax.random.normal(k_b1, (H_FEATS,), dtype=jnp.float32)
    w2 = xavier_uniform(k_w2, H_FEATS, NUM_CLASSES)
    b2 = 0.05 * jax.random.normal(k_b2, (NUM_CLASSES,), dtype=jnp.float32)

    # Prepare padded / pre-projected operands ONCE (hoisted off the hot path),
    # then run the kernels.  tm=64, tk=128 -> layer-1 grid (4, 2): exercises the
    # row tiling, the K-axis tiling, the SA accumulation and padded-row masking.
    ops, meta = prepare_gcn_operands(a_norm, x, w1, b1, w2, b2, s, tm=64, tk=128)
    out = gcn_forward_prepared(ops, meta)
    out = jax.block_until_ready(out)

    # Precision-matched pure-JAX reference (same bf16 MXU inputs, f32 accum).
    def bf(v):
        return v.astype(jnp.bfloat16).astype(jnp.float32)

    xw1_q = bf(x @ w1)
    h1_ref = jnp.maximum(bf(a_norm) @ xw1_q + b1[None, :], 0.0)
    p_ref = bf(bf(h1_ref) @ bf(w2))
    sa_ref = bf(s) @ bf(a_norm)
    ref = jnp.maximum(bf(sa_ref) @ p_ref + b2[None, :], 0.0)

    assert out.shape == (NUM_GRAPHS, NUM_CLASSES)
    err = float(jnp.max(jnp.abs(out - ref)))
    assert jnp.allclose(out, ref, atol=2e-2, rtol=2e-2), f"max abs err {err}"

    print("KERNEL_OK")
</pallas_src>

<mosaic_0001>
module attributes {stable_mosaic.version = 11 : i64} {
  func.func @kernel(%arg0: i32, %arg1: i32, %arg2: memref<64x128xbf16, #tpu.memory_space<vmem>>, %arg3: memref<128x128xbf16, #tpu.memory_space<vmem>>, %arg4: memref<64x8xf32, #tpu.memory_space<vmem>>, %arg5: memref<1x128xf32, #tpu.memory_space<vmem>>, %arg6: memref<128x128xbf16, #tpu.memory_space<vmem>>, %arg7: memref<64x128xbf16, #tpu.memory_space<vmem>>, %arg8: memref<8x256xf32, #tpu.memory_space<vmem>>, %arg9: memref<64x128xf32, #tpu.memory_space<vmem>>) attributes {dimension_semantics = [#tpu.dimension_semantics<arbitrary>, #tpu.dimension_semantics<arbitrary>], iteration_bounds = array<i64: 4, 2>, scalar_prefetch = 0 : i64, scratch_operands = 1 : i64, tpu.core_type = #tpu.core_type<tc>, window_params = [{transform_indices = @transform_0, window_bounds = array<i64: 64, 128>}, {transform_indices = @transform_1, window_bounds = array<i64: 128, 128>}, {transform_indices = @transform_2, window_bounds = array<i64: 64, 8>}, {pipeline_mode = #tpu.pipeline_mode<synchronous>, transform_indices = @transform_3, window_bounds = array<i64: 1, 128>}, {pipeline_mode = #tpu.pipeline_mode<synchronous>, transform_indices = @transform_4, window_bounds = array<i64: 128, 128>}, {transform_indices = @transform_5, window_bounds = array<i64: 64, 128>}, {pipeline_mode = #tpu.pipeline_mode<synchronous>, transform_indices = @transform_6, window_bounds = array<i64: 8, 256>}]} {
    %c0_i32 = arith.constant 0 : i32
    %0 = arith.cmpi eq, %arg0, %c0_i32 : i32
    %c0_i32_0 = arith.constant 0 : i32
    %1 = arith.cmpi eq, %arg1, %c0_i32_0 : i32
    %2 = arith.andi %0, %1 : i1
    %3 = arith.extui %2 : i1 to i32
    %c0_i32_1 = arith.constant 0 : i32
    %4 = arith.cmpi ne, %3, %c0_i32_1 : i32
    scf.if %4 {
      %cst_19 = arith.constant 0.000000e+00 : f32
      %28 = vector.broadcast %cst_19 : f32 to vector<8x256xf32>
      %c0_20 = arith.constant 0 : index
      %c0_21 = arith.constant 0 : index
      %29 = vector.load %arg8[%c0_20, %c0_21] : memref<8x256xf32, #tpu.memory_space<vmem>>, vector<8x256xf32>
      tpu.vector_store %arg8[%c0_20, %c0_21], %28 {strides = array<i32>} : memref<8x256xf32, #tpu.memory_space<vmem>>, vector<8x256xf32>,
    } else {
    }
    %c0_i32_2 = arith.constant 0 : i32
    %5 = arith.cmpi eq, %arg1, %c0_i32_2 : i32
    %6 = arith.extui %5 : i1 to i32
    %c0_i32_3 = arith.constant 0 : i32
    %7 = arith.cmpi ne, %6, %c0_i32_3 : i32
    scf.if %7 {
      %cst_19 = arith.constant 0.000000e+00 : f32
      %28 = vector.broadcast %cst_19 : f32 to vector<64x128xf32>
      %c0_20 = arith.constant 0 : index
      %c0_21 = arith.constant 0 : index
      %29 = vector.load %arg9[%c0_20, %c0_21] : memref<64x128xf32, #tpu.memory_space<vmem>>, vector<64x128xf32>
      tpu.vector_store %arg9[%c0_20, %c0_21], %28 {strides = array<i32>} : memref<64x128xf32, #tpu.memory_space<vmem>>, vector<64x128xf32>,
    } else {
    }
    %c0 = arith.constant 0 : index
    %c0_4 = arith.constant 0 : index
    %8 = vector.load %arg9[%c0, %c0_4] : memref<64x128xf32, #tpu.memory_space<vmem>>, vector<64x128xf32>
    %c0_5 = arith.constant 0 : index
    %c0_6 = arith.constant 0 : index
    %9 = vector.load %arg2[%c0_5, %c0_6] : memref<64x128xbf16, #tpu.memory_space<vmem>>, vector<64x128xbf16>
    %c0_7 = arith.constant 0 : index
    %c0_8 = arith.constant 0 : index
    %10 = vector.load %arg3[%c0_7, %c0_8] : memref<128x128xbf16, #tpu.memory_space<vmem>>, vector<128x128xbf16>
    %cst = arith.constant dense<0.000000e+00> : vector<64x128xf32>
    %11 = tpu.matmul %9, %10, %cst {dimension_numbers = #tpu.dot_dimension_numbers<[1], [0], [0], [1], [0, 0, 1, 1], [], []>} : vector<64x128xbf16>, vector<128x128xbf16>, vector<64x128xf32> -> vector<64x128xf32>
    %12 = arith.addf %8, %11 : vector<64x128xf32>
    %c0_9 = arith.constant 0 : index
    %c0_10 = arith.constant 0 : index
    %13 = vector.load %arg9[%c0_9, %c0_10] : memref<64x128xf32, #tpu.memory_space<vmem>>, vector<64x128xf32>
    tpu.vector_store %arg9[%c0_9, %c0_10], %12 {strides = array<i32>} : memref<64x128xf32, #tpu.memory_space<vmem>>, vector<64x128xf32>,
    %c128_i32 = arith.constant 128 : i32
    %14 = arith.muli %arg1, %c128_i32 : i32
    %15 = tpu.assume_multiple %14, 128 : i32
    %c0_11 = arith.constant 0 : index
    %c0_12 = arith.constant 0 : index
    %16 = vector.load %arg4[%c0_11, %c0_12] : memref<64x8xf32, #tpu.memory_space<vmem>>, vector<64x8xf32>
    %17 = arith.truncf %16 : vector<64x8xf32> to vector<64x8xbf16>
    %c0_13 = arith.constant 0 : index
    %c0_14 = arith.constant 0 : index
    %18 = vector.load %arg2[%c0_13, %c0_14] : memref<64x128xbf16, #tpu.memory_space<vmem>>, vector<64x128xbf16>
    %cst_15 = arith.constant dense<0.000000e+00> : vector<8x128xf32>
    %19 = tpu.matmul %17, %18, %cst_15 {dimension_numbers = #tpu.dot_dimension_numbers<[0], [0], [1], [1], [0, 1, 1, 1], [], []>} : vector<64x8xbf16>, vector<64x128xbf16>, vector<8x128xf32> -> vector<8x128xf32>
    %c0_16 = arith.constant 0 : index
    %20 = arith.index_cast %15 : i32 to index
    %21 = vector.load %arg8[%c0_16, %20] : memref<8x256xf32, #tpu.memory_space<vmem>>, vector<8x128xf32>
    %22 = arith.addf %21, %19 : vector<8x128xf32>
    %c0_17 = arith.constant 0 : index
    %23 = arith.index_cast %15 : i32 to index
    %24 = vector.load %arg8[%c0_17, %23] : memref<8x256xf32, #tpu.memory_space<vmem>>, vector<8x128xf32>
    tpu.vector_store %arg8[%c0_17, %23], %22 {strides = array<i32>} : memref<8x256xf32, #tpu.memory_space<vmem>>, vector<8x128xf32>,
    %c1_i32 = arith.constant 1 : i32
    %25 = arith.cmpi eq, %arg1, %c1_i32 : i32
    %26 = arith.extui %25 : i1 to i32
    %c0_i32_18 = arith.constant 0 : i32
    %27 = arith.cmpi ne, %26, %c0_i32_18 : i32
    scf.if %27 {
      %c0_19 = arith.constant 0 : index
      %c0_20 = arith.constant 0 : index
      %28 = vector.load %arg9[%c0_19, %c0_20] : memref<64x128xf32, #tpu.memory_space<vmem>>, vector<64x128xf32>
      %c0_21 = arith.constant 0 : index
      %c0_22 = arith.constant 0 : index
      %29 = vector.load %arg5[%c0_21, %c0_22] : memref<1x128xf32, #tpu.memory_space<vmem>>, vector<1x128xf32>
      %30 = vector.broadcast %29 : vector<1x128xf32> to vector<64x128xf32>
      %31 = arith.addf %28, %30 : vector<64x128xf32>
      %cst_23 = arith.constant 0.000000e+00 : f32
      %32 = vector.broadcast %cst_23 : f32 to vector<64x128xf32>
      %33 = arith.maximumf %31, %32 : vector<64x128xf32>
      %34 = tpu.iota {dimensions = array<i32: 0>} : vector<64x128xi32>
      %c64_i32 = arith.constant 64 : i32
      %35 = arith.muli %arg0, %c64_i32 : i32
      %36 = vector.broadcast %35 : i32 to vector<64x128xi32>
      %37 = arith.addi %34, %36 : vector<64x128xi32>
      %c160_i32 = arith.constant 160 : i32
      %38 = vector.broadcast %c160_i32 : i32 to vector<64x128xi32>
      %39 = arith.cmpi slt, %37, %38 : vector<64x128xi32>
      %cst_24 = arith.constant 0.000000e+00 : f32
      %40 = vector.broadcast %cst_24 : f32 to vector<64x128xf32>
      %41 = arith.select %39, %33, %40 : vector<64x128xi1>, vector<64x128xf32>
      %42 = arith.truncf %41 : vector<64x128xf32> to vector<64x128xbf16>
      %c0_25 = arith.constant 0 : index
      %c0_26 = arith.constant 0 : index
      %43 = vector.load %arg6[%c0_25, %c0_26] : memref<128x128xbf16, #tpu.memory_space<vmem>>, vector<128x128xbf16>
      %cst_27 = arith.constant dense<0.000000e+00> : vector<64x128xf32>
      %44 = tpu.matmul %42, %43, %cst_27 {dimension_numbers = #tpu.dot_dimension_numbers<[1], [0], [0], [1], [0, 0, 1, 1], [], []>} : vector<64x128xbf16>, vector<128x128xbf16>, vector<64x128xf32> -> vector<64x128xf32>
      %45 = arith.truncf %44 : vector<64x128xf32> to vector<64x128xbf16>
      %c0_28 = arith.constant 0 : index
      %c0_29 = arith.constant 0 : index
      %46 = vector.load %arg7[%c0_28, %c0_29] : memref<64x128xbf16, #tpu.memory_space<vmem>>, vector<64x128xbf16>
      tpu.vector_store %arg7[%c0_28, %c0_29], %45 {strides = array<i32>} : memref<64x128xbf16, #tpu.memory_space<vmem>>, vector<64x128xbf16>,
    } else {
    }
    return
  }
  func.func @transform_0(%arg0: i32, %arg1: i32) -> (i32, i32) {
    %c0_i32 = arith.constant 0 : i32
    return %arg0, %arg1 : i32, i32
  }
  func.func @transform_1(%arg0: i32, %arg1: i32) -> (i32, i32) {
    %c0_i32 = arith.constant 0 : i32
    %c0_i32_0 = arith.constant 0 : i32
    return %arg1, %c0_i32 : i32, i32
  }
  func.func @transform_2(%arg0: i32, %arg1: i32) -> (i32, i32) {
    %c0_i32 = arith.constant 0 : i32
    %c0_i32_0 = arith.constant 0 : i32
    return %arg0, %c0_i32 : i32, i32
  }
  func.func @transform_3(%arg0: i32, %arg1: i32) -> (i32, i32) {
    %c0_i32 = arith.constant 0 : i32
    %c0_i32_0 = arith.constant 0 : i32
    %c0_i32_1 = arith.constant 0 : i32
    return %c0_i32, %c0_i32_0 : i32, i32
  }
  func.func @transform_4(%arg0: i32, %arg1: i32) -> (i32, i32) {
    %c0_i32 = arith.constant 0 : i32
    %c0_i32_0 = arith.constant 0 : i32
    %c0_i32_1 = arith.constant 0 : i32
    return %c0_i32, %c0_i32_0 : i32, i32
  }
  func.func @transform_5(%arg0: i32, %arg1: i32) -> (i32, i32) {
    %c0_i32 = arith.constant 0 : i32
    %c0_i32_0 = arith.constant 0 : i32
    return %arg0, %c0_i32 : i32, i32
  }
  func.func @transform_6(%arg0: i32, %arg1: i32) -> (i32, i32) {
    %c0_i32 = arith.constant 0 : i32
    %c0_i32_0 = arith.constant 0 : i32
    %c0_i32_1 = arith.constant 0 : i32
    return %c0_i32, %c0_i32_0 : i32, i32
  }
}

</mosaic_0001>

<bundles_post_ra>
// kernel: tpu_custom_call.1
= control target key start
LH: loop header
LB: loop body
LE: loop exit
PB: predicated region body
PF: predicated region fallthrough
CT: control target
= control target key end

     0   :  { %s2202_s0 = inlined_call_operand.vmem [shape: bf16[256,256], index: 0, kind: input, shape index: {}]   ;;  %s2203_s1 = inlined_call_operand.hbm [shape: bf16[256,128], index: 1, kind: input, shape index: {}]   ;;  %s2204_s2 = inlined_call_operand.vmem [shape: f32[256,8], index: 2, kind: input, shape index: {}]   ;;  %s2205_s3 = inlined_call_operand.vmem [shape: f32[1,128], index: 3, kind: input, shape index: {}]   ;;  %s2206_s4 = inlined_call_operand.hbm [shape: bf16[128,128], index: 4, kind: input, shape index: {}]   ;;  %s2207_s5 = inlined_call_operand.hbm [shape: bf16[256,128], index: 5, kind: output, shape index: {0}]   ;;  %s2208_s6 = inlined_call_operand.hbm [shape: f32[8,256], index: 6, kind: output, shape index: {1}]  }
   0x1   :  { %2228 = sst [smem:[#allocation26_spill]] %s2204_s2 }
   0x2   :  { %2229 = sst [smem:[#allocation27_spill]] %s2205_s3 }
   0x3   :  { %2230 = sst [smem:[#allocation28_spill]] %s2207_s5 }
   0x4   :  { %2231 = sst [smem:[#allocation29_spill]] %s2208_s6 }
   0x5   :  { %12 = vsyncpa [#allocation5], 0 }
   0x6   :  { %14 = vsyncpa [#allocation5 + $0x1], 0 }
   0x7   :  { %15 = vsyncpa [#allocation8], 0 }
   0x8   :  { %16 = vsyncpa [#allocation6], 0 }
   0x9   :  { %18 = vsyncpa [#allocation6 + $0x1], 0 }
   0xa   :  { %19 = vsyncpa [#allocation11], 0  ;;  %s1800_s21 = smov 0   ;;  %s1802_s22 = smov 0  }
   0xb   :  { %s1804_s23 = smov 0   ;;  %s1806_s24 = smov 0  }
   0xc   :  { %s1808_s25 = smov 0   ;;  %s1810_s26 = smov 0  }
   0xd   :  { %s1812_s27 = smov 0   ;;  %s1814_s28 = smov 0  }
   0xe   :  { %s1816_s29 = smov 0   ;;  %s1818_s30 = smov 0  }
   0xf   :  { %s1820_s7 = smov 0   ;;  %s1822_s8 = smov 0  }
  0x10   :  { %s1824_s9 = smov 0  }
  0x11 LB: > { %2232 = sst [smem:[#allocation16_spill]] %s1701_s21  ;;  %s1139_s10 = sadd.s32 4294967295, %s1749_s9   ;;  %s1749_s9 = sphi %s1824_s9, %s25_s9   ;;  %s1745_s8 = sphi %s1822_s8, %s2286_s8   ;;  %s1741_s7 = sphi %s1820_s7, %s2285_s7   ;;  %s1737_s30 = sphi %s1818_s30, %s2284_s30   ;;  %s1733_s29 = sphi %s1816_s29, %s2283_s29   ;;  %s1729_s28 = sphi %s1814_s28, %s2282_s28   ;;  %s1725_s27 = sphi %s1812_s27, %s2281_s27   ;;  %s1721_s26 = sphi %s1810_s26, %s2280_s26   ;;  %s1717_s25 = sphi %s1808_s25, %s2279_s25   ;;  %s1713_s24 = sphi %s1806_s24, %s2278_s24   ;;  %s1709_s23 = sphi %s1804_s23, %s2271_s23   ;;  %s1705_s22 = sphi %s1802_s22, %s2277_s22   ;;  %s1701_s21 = sphi %s1800_s21, %s2276_s21  }
  0x12   : > { %2233 = sst [smem:[#allocation17_spill]] %s1709_s23  ;;  %s34_s12 = sadd.s32 1, %s1741_s7 }
  0x13   : > { %s37_s13 = sadd.s32 1, %s1745_s8  ;;  %p35_p0 = scmp.ge.s32.totalorder %s34_s12, 2 }
  0x14   : > { %s46_s14 = sadd.s32 1, %s1729_s28  ;;  %p53_p1 = scmp.ne.s32.totalorder %s1729_s28, %s1725_s27 }
  0x15   : > { %p54_p2 = scmp.eq.s32.totalorder %s1749_s9, 0  ;;  %s2288_s12 = smov (%p35_p0, %s34_s12), 0 }
  0x16   : > { %2234 = sst [smem:[#allocation18_spill]] %s2288_s12  ;;  %s2290_s13 = smov (!%p35_p0, %s37_s13), %s1745_s8 }
  0x17   : > { %s42_s15 = ssub.s32 %s1741_s7, %s2288_s12  ;;  %p1878_p3 = por %p54_p2, %p53_p1 }
  0x18   : > { %p39_p4 = scmp.ge.s32.totalorder %s2290_s13, 4  ;;  %p70_p5 = scmp.eq.s32.totalorder %s42_s15, 0 }
  0x19   : > { %s2235_s16 = scalar_select %p1878_p3, 1, 0 }
  0x1a   : > { %s72_s17 = sadd.s32 1, %s1721_s26  ;;  %p79_p6 = scmp.ne.s32.totalorder %s1721_s26, %s1717_s25 }
  0x1b   : > { %s2292_s13 = smov (%p39_p4, %s2290_s13), 0  ;;  %p85_p8 = scmp.ne.s32.totalorder %s1717_s25, %s1713_s24 }
  0x1c   : > { %2236 = sst [smem:[#allocation19_spill]] %s2292_s13  ;;  %s41_s19 = ssub.s32 %s1745_s8, %s2292_s13 }
  0x1d   : > { %s1888_s18 = scalar_select %p70_p5, %s1721_s26, %s72_s17  }
  0x1e   : > { %p1892_p7 = por %p79_p6, %p54_p2  ;;  %s43_s11 = sor.u32 %s42_s15, %s41_s19 }
  0x1f   : > { %2237 = sst [smem:[#allocation20_spill]] %s1888_s18  ;;  %p44_p9 = scmp.eq.s32.totalorder %s43_s11, 0 }
  0x20   : > { %s2238_s20 = scalar_select %p1892_p7, 1, 0 }
  0x21   : > { %p1900_p10 = scmp.eq.s32.totalorder %s1139_s10, 0  ;;  %p164_p11 = scmp.eq.s32.totalorder %s41_s19, 0 }
  0x22   : > { %s166_s6 = sadd.s32 1, %s1709_s23  ;;  %p176_p13 = scmp.ne.s32.totalorder %s1709_s23, %s1705_s22 }
  0x23   : > { %s2239_s12 = scalar_select %p1900_p10, 1, 0 }
  0x24   : > { %s1906_s17 = scalar_select %p44_p9, %s1729_s28, %s46_s14  }
  0x25   : > { %p1910_p12 = por %p1900_p10, %p85_p8  ;;  %p1921_p0 = scmp.eq.s32.totalorder %s1139_s10, 7 }
  0x26   : > { %2240 = sst [smem:[#allocation21_spill]] %s1906_s17  ;;  %p182_p1 = scmp.ne.s32.totalorder %s1705_s22, %s1701_s21 }
  0x27   : > { %s2241_s13 = scalar_select %p1910_p12, 1, 0 }
  0x28   : > { %s1917_s15 = scalar_select %p164_p11, %s1709_s23, %s166_s6  }
  0x29   : > { %s2243_s24 = scalar_select %p1921_p0, 1, 0 }
  0x2a   : > { %2242 = sst [smem:[#allocation22_spill]] %s1917_s15  ;;  %s2245_s11 = sadd.s32 4294967294, %s1749_s9  }
  0x2b   : > { %2244 = sst [smem:[#allocation23_spill]] %s2243_s24  ;;  %p183_p2 = scmp.eq.s32.totalorder %s2245_s11, 7 }
  0x2c   : > { %p1141_p4 = scmp.ge.s32.totalorder %s1749_s9, 1  ;;  %p1932_p5 = por %p1921_p0, %p176_p13 }
  0x2d   : > { %p211_p6 = scmp.lt.s32.totalorder %s1749_s9, 9  ;;  %p1937_p8 = por %p183_p2, %p182_p1 }
  0x2e   : > { %s2246_s14 = scalar_select %p1932_p5, 1, 0 }
  0x2f   : > { %s2248_s19 = scalar_select %p1937_p8, 1, 0 }
  0x30   : > { %2247 = sst [smem:[#allocation24_spill]] %s2246_s14  ;;  %p1941_p9 = pnand %p1141_p4, %p211_p6 }
  0x31   : > { %2249 = sst [smem:[#allocation25_spill]] %s2248_s19  ;;  %s1751_s10 = smov [#allocation7]  }
  0x32   : > { %s2250_s6 = scalar_select %p1941_p9, 1, 0 }
  0x33   : > { %s226_s17 = sshll.u32 %s1751_s10, 4  ;;  %p1367_p11 = pneg %p1941_p9  ;;  %s227_s17 = int_to_ptr.vmem [resolvable:$true] %s226_s17 }
  0x34   : > { %s1521_s23 = scalar_lea.hbm %s2206_s4, 1024 }
  0x35   : > { %p1949_p13 = pnand %p1367_p11, %p1900_p10  ;;  %p1522_p1 = scmp.ne.s32.totalorder %s2206_s4, %s1521_s23 }
  0x36   : > { %p1528_p11 = scmp.lt.u32.totalorder %s1521_s23, %s2206_s4 }
  0x37   : > { %p1523_p2 = pneg %p1949_p13 }
  0x39   : > { %p1524_p4 = pnand %p1523_p2, %p1522_p1 }
  0x3b   : > { %p1525_p6 = pneg %p1524_p4 }
  0x3d   : > { %p1530_p8 = pnand %p1528_p11, %p1525_p6 }
  0x3f   : > { %1533 = shalt.err (!%p1530_p8)
}
  0x40   : > { %s1534_s5 = scalar_lea.vmem %s227_s17, 1024  ;;  %p1542_p12 = scmp.lt.s32.totalorder %s227_s17, %s227_s17 }
  0x41   : > { %p1535_p0 = scmp.ne.s32.totalorder %s227_s17, %s1534_s5  ;;  %p1543_p9 = scmp.lt.s32.totalorder %s1534_s5, %s1534_s5 }
  0x43   : > { %p1537_p5 = pnand %p1535_p0, %p1523_p2  ;;  %p1544_p7 = por %p1543_p9, %p1542_p12 }
  0x45   : > { %p1538_p10 = pneg %p1537_p5 }
  0x47   : > { %p1545_p3 = pnand %p1544_p7, %p1538_p10 }
  0x49   : > { %1548 = shalt.err (!%p1545_p3)
}
  0x4a   : > { %s1752_s21 = smov 64   ;;  %s1753_s18 = smov 4  }
  0x4b   : > { %1370 = dma.hbm_to_vmem [thread:$0]  (!%p1949_p13), %s2206_s4, 1024, %s227_s17, [#allocation8], %s1752_s21, %s1752_s21, %s1753_s18  }
  0x4c   : > { %p1143_p1 = scmp.ge.s32.totalorder %s1749_s9, 8 }
  0x4d   : > { %p2252_p8 = scmp.ne.s32.totalorder (!%p1143_p1), %s2235_s16, 0 }
  0x4e   : > { %236 = sbr.rel (%p1143_p1) target bundleno = 123 (0x7b), region = 24 }
  0x55   : > { %239 = sbr.rel (!%p2252_p8) target bundleno = 96 (0x60), region = 28  ;;  %s241_s5 = sand.u32 (%p2252_p8), 1, %s1729_s28  }
  0x56   : > { %s1216_s23 = sshll.u32 (%p2252_p8), %s1745_s8, 4  ;;  %s1144_s24 = sshll.u32 (%p2252_p8), %s241_s5, 5 }
  0x57   : > { %s246_s10 = sadd.s32 (%p2252_p8), %s1741_s7, %s1216_s23  ;;  %s243_s17 = scalar_lea.vmem (%p2252_p8), [#allocation3], %s1144_s24 }
  0x58   : > { %s1147_s14 = sshll.u32 (%p2252_p8), %s246_s10, 2 }
  0x59   : > { %s248_s2 = scalar_lea.vmem (%p2252_p8), %s2202_s0, %s1147_s14 }
  0x5a   : > { %v264_v0 = vld [vmem:[%s248_s2] sm:$0xf] (%p2252_p8)  ;;  %v266_v1 = vld [vmem:[%s248_s2 + $0x8] sm:$0xf] (%p2252_p8)  ;;  %v268_v2 = vld [vmem:[%s248_s2 + $0x10] sm:$0xf] (%p2252_p8) }
  0x5b   : > { %265 = vst [vmem:[%s243_s17] sm:$0xf] (%p2252_p8), %v264_v0  ;;  %267 = vst [vmem:[%s243_s17 + $0x4] sm:$0xf] (%p2252_p8), %v266_v1  ;;  %v270_v3 = vld [vmem:[%s248_s2 + $0x18] sm:$0xf] (%p2252_p8) }
  0x5c   : > { %269 = vst [vmem:[%s243_s17 + $0x8] sm:$0xf] %v268_v2  ;;  %v272_v4 = vld [vmem:[%s248_s2 + $0x20] sm:$0xf]  ;;  %v274_v5 = vld [vmem:[%s248_s2 + $0x28] sm:$0xf] }
  0x5d   : > { %271 = vst [vmem:[%s243_s17 + $0xc] sm:$0xf] %v270_v3  ;;  %273 = vst [vmem:[%s243_s17 + $0x10] sm:$0xf] %v272_v4  ;;  %v276_v6 = vld [vmem:[%s248_s2 + $0x30] sm:$0xf] }
  0x5e   : > { %275 = vst [vmem:[%s243_s17 + $0x14] sm:$0xf] %v274_v5  ;;  %v278_v7 = vld [vmem:[%s248_s2 + $0x38] sm:$0xf]  ;;  %277 = vst [vmem:[%s243_s17 + $0x18] sm:$0xf] %v276_v6 }
  0x5f   : > { %279 = vst [vmem:[%s243_s17 + $0x1c] sm:$0xf] %v278_v7 }
  0x60 PF: > { %s319_s3 = sand.u32 1, %s1721_s26   ;;  %s1217_s16 = sshll.u32 %s1741_s7, 10 }
  0x61   : > { %s1148_s14 = sshll.u32 %s319_s3, 6  ;;  %s1983_s15 = scalar_lea.hbm %s2203_s1, %s1217_s16 }
  0x62   : > { %s323_s19 = scalar_lea.vmem [#allocation4], %s1148_s14  ;;  %s1987_s5 = scalar_lea.sflag [#allocation5], %s319_s3 }
  0x63   : > { %s330_s2 = sshll.u32 %s323_s19, 4  ;;  %s1549_s23 = scalar_lea.hbm %s1983_s15, 1024  ;;  %s1985_s2 = int_to_ptr.vmem [resolvable:$true] %s330_s2 }
  0x64   : > { %p1550_p3 = scmp.ne.s32.totalorder %s1983_s15, %s1549_s23  ;;  %p2253_p7 = scmp.ne.s32.totalorder %s2238_s20, 0 }
  0x65   : > { %s1553_s11 = scalar_lea.hbm %s2203_s1, 2048  ;;  %p1554_p0 = scmp.lt.u32.totalorder %s1983_s15, %s2203_s1 }
  0x66   : > { %p1551_p10 = pnand %p1550_p3, %p2253_p7  ;;  %p1555_p5 = scmp.lt.u32.totalorder %s1553_s11, %s1549_s23 }
  0x67   : > { %p1557_p13 = scmp.lt.u32.totalorder %s1549_s23, %s1983_s15 }
  0x68   : > { %p1552_p12 = pneg %p1551_p10  ;;  %p1556_p9 = por %p1555_p5, %p1554_p0 }
  0x6a   : > { %p1558_p2 = por %p1557_p13, %p1556_p9 }
  0x6c   : > { %p1559_p4 = pnand %p1558_p2, %p1552_p12 }
  0x6e   : > { %1562 = shalt.err (!%p1559_p4)
}
  0x6f   : > { %s1563_s3 = scalar_lea.vmem %s1985_s2, 1024  ;;  %s1754_s14 = smov [#allocation4]  }
  0x70   : > { %p1564_p6 = scmp.ne.s32.totalorder %s1985_s2, %s1563_s3  ;;  %s1567_s21 = sshll.u32 %s1754_s14, 4  ;;  %s1568_s21 = int_to_ptr.vmem [resolvable:$false] %s1567_s21 }
  0x71   : > { %s1569_s18 = scalar_lea.vmem %s1568_s21, 2048  ;;  %p1570_p8 = scmp.lt.s32.totalorder %s1985_s2, %s1568_s21 }
  0x72   : > { %p1565_p11 = pnand %p1564_p6, %p2253_p7  ;;  %p1571_p3 = scmp.lt.s32.totalorder %s1569_s18, %s1563_s3 }
  0x74   : > { %p1566_p1 = pneg %p1565_p11  ;;  %p1572_p10 = por %p1571_p3, %p1570_p8 }
  0x76   : > { %p1573_p0 = pnand %p1572_p10, %p1566_p1 }
  0x78   : > { %1576 = shalt.err (!%p1573_p0)
}
  0x79   : > { %s1755_s19 = smov 64   ;;  %s1756_s23 = smov 4  }
  0x7a   : > { %1357 = dma.hbm_to_vmem [thread:$0]  (%p2253_p7), %s1983_s15, 1024, %s1985_s2, %s1987_s5, %s1755_s19, %s1755_s19, %s1756_s23  }
  0x7b PF: > { %p2254_p12 = scmp.ne.s32.totalorder %s2250_s6, 0 }
  0x7c   : > { %s354_s24 = sand.u32 (!%p2254_p12), 1, %s1725_s27   ;;  %s360_s10 = sand.u32 (!%p2254_p12), 1, %s1717_s25  }
  0x7d   : > { %351 = sbr.rel (%p2254_p12) target bundleno = 756 (0x2f4), region = 77  ;;  %s1152_s11 = sshll.u32 (!%p2254_p12), %s354_s24, 5 }
  0x7e   : > { %s1153_s17 = sshll.u32 (!%p2254_p12), %s360_s10, 6  ;;  %s2015_s16 = scalar_lea.vmem (!%p2254_p12), [#allocation3], %s1152_s11 }
  0x7f   : > { %s361_s3 = scalar_lea.sflag (!%p2254_p12), [#allocation5], %s360_s10  ;;  %s2017_s14 = scalar_lea.vmem (!%p2254_p12), [#allocation4], %s1153_s17 }
  0x80   : > { %p2255_p5 = scmp.ne.s32.totalorder (!%p2254_p12), %s2241_s13, 0 }
  0x84   : > { %1684 = dma.done.wait (%p2255_p5), %s361_s3, 1024  }
  0x85   : > { %1686 = vsyncadd (%p2255_p5), %s361_s3, 4294966272  ;;  %p2256_p7 = scmp.ne.s32.totalorder %s2239_s12, 0 }
  0x87   : > { %1688 = dma.done.wait (%p2256_p7), [#allocation8], 1024  }
  0x88   : > { %1690 = vsyncadd (%p2256_p7), [#allocation8], 4294966272  ;;  %s401_s27 = sand.u32 1, %s1705_s22   ;;  %s1156_s20 = sshll.u32 %s1737_s30, 3 }
  0x89   : > { %s1155_s6 = sshll.u32 %s401_s27, 5  ;;  %p409_p9 = scmp.lt.s32.totalorder %s1156_s20, 31 }
  0x8a   : > { %p416_p13 = scmp.eq.s32.totalorder %s1737_s30, 0  ;;  %p417_p2 = scmp.eq.s32.totalorder %s1733_s29, 0 }
  0x8b   : > { %s2294_s20 = smov (!%p409_p9, %s1156_s20), 31  ;;  %s2257_s5 = sld [smem:[#allocation26_spill]] }
  0x8c   : > { %s1157_s13 = sshll.u32 %s2294_s20, 3  ;;  %p418_p4 = pnand %p417_p2, %p416_p13 }
  0x8d   : > { %s2038_s12 = scalar_lea.vmem [#allocation9], %s1155_s6  ;;  %v1757_v8 = vmov (!%p418_p4), 0.0  }
  0x8e   : > { %421 = sbr.rel (%p418_p4) target bundleno = 149 (0x95), region = 93  ;;  %422 = vst [vmem:[#allocation10] sm:$0xff] (!%p418_p4), %v1757_v8  ;;  %423 = vst [vmem:[#allocation10 + $0x8] sm:$0xff] (!%p418_p4), %v1757_v8 }
  0x91   : > { %s2036_s21 = scalar_lea.vmem %s2257_s5, %s1157_s13 }
  0x95 PF: > { %p1158_p6 = scmp.ne.s32.totalorder %s1733_s29, 0 }
  0x96   : > { %v1758_v9 = vmov (!%p1158_p6), 0.0  }
  0x97   : > { %426 = sbr.rel (%p1158_p6) target bundleno = 158 (0x9e), region = 97  ;;  %427 = vst [vmem:[#allocation2] sm:$0xff] (!%p1158_p6), %v1758_v9  ;;  %428 = vst [vmem:[#allocation2 + $0x8] sm:$0xff] (!%p1158_p6), %v1758_v9 }
  0x98   : > { %429 = vst [vmem:[#allocation2 + $0x10] sm:$0xff] (!%p1158_p6), %v1758_v9  ;;  %430 = vst [vmem:[#allocation2 + $0x18] sm:$0xff] (!%p1158_p6), %v1758_v9 }
  0x99   : > { %431 = vst [vmem:[#allocation2 + $0x20] sm:$0xff] (!%p1158_p6), %v1758_v9  ;;  %432 = vst [vmem:[#allocation2 + $0x28] sm:$0xff] (!%p1158_p6), %v1758_v9 }
  0x9a   : > { %433 = vst [vmem:[#allocation2 + $0x30] sm:$0xff] (!%p1158_p6), %v1758_v9  ;;  %434 = vst [vmem:[#allocation2 + $0x38] sm:$0xff] (!%p1158_p6), %v1758_v9 }
  0x9e PF: > { %v621_v10 = vld [vmem:[%s2036_s21] sm:$0xff]  ;;  %v622_v11 = vld [vmem:[%s2036_s21 + $0x8] sm:$0xff]  ;;  %v623_v12 = vld [vmem:[%s2036_s21 + $0x10] sm:$0xff]  ;;  %v1759_v15 = vmov 0.0   ;;  %vm1760_vm0 = vmmov 0   ;;  %vm681_vm1 = vcmask 523264  }
  0x9f   : > { %v629_v13 = vpack.c.bf16 %v622_v11, %v621_v10  ;;  %v624_v14 = vld [vmem:[%s2036_s21 + $0x18] sm:$0xff]  ;;  %1303 = vmatprep.subr.bf16.mxu1 %v1759_v15  ;;  %1311 = vmatprep.mubr.msk.bf16.mxu1 %vm1760_vm0, %v1759_v15  ;;  %v625_v16 = vld [vmem:[%s2036_s21 + $0x20] sm:$0xff]  ;;  %v626_v17 = vld [vmem:[%s2036_s21 + $0x28] sm:$0xff]  ;;  %s1171_s18 = sshll.u32 %s1733_s29, 7  ;;  %p1178_p11 = scmp.ne.s32.totalorder %s1733_s29, 1 }
  0xa0   : > { %v630_v18 = vpack.c.bf16 %v624_v14, %v623_v12  ;;  %v1497_v19 = vld [vmem:[%s2017_s14] sm:$0xff]   ;;  %v1498_v20 = vld [vmem:[%s2017_s14 + $0x8] sm:$0xff]   ;;  %v627_v21 = vld [vmem:[%s2036_s21 + $0x30] sm:$0xff]  ;;  %v631_v22 = vpack.c.bf16 %v626_v17, %v625_v16  ;;  %s725_s19 = sshra.s32 %s1171_s18, 7  ;;  %v767_v7 = vlaneseq (!%p1178_p11)  ;;  %s1180_s10 = sshll.u32 (!%p1178_p11), %s1737_s30, 6 }
  0xa1   : > { %641 = vxpose.xlu0.c.b16.start [1/4] (short) (narrow) %v629_v13, 16  ;;  %1279 = vmatprep.subr.bf16.mxu0 %v1497_v19  ;;  %v1499_v23 = vld [vmem:[%s2017_s14 + $0x10] sm:$0xff]   ;;  %v628_v24 = vld [vmem:[%s2036_s21 + $0x38] sm:$0xff]  ;;  %v1505_v27 = vld [vmem:[%s2015_s16] sm:$0xff]   ;;  %s1177_s23 = sshll.u32 %s725_s19, 3  ;;  %v2070_v10 = vstv (!%p1178_p11), %s1180_s10  ;;  %s2258_s17 = sld [smem:[#allocation27_spill]] (!%p1178_p11) }
  0xa2   : > { %1280 = vmatpush3.bf16.msra.mxu0 %v1497_v19  ;;  %v1500_v25 = vld [vmem:[%s2017_s14 + $0x18] sm:$0xff]   ;;  %v632_v26 = vpack.c.bf16 %v628_v24, %v627_v21  ;;  %v1506_v28 = vld [vmem:[%s2015_s16] sm:$0xff]   ;;  %1295 = vmatprep.mubr.bf16.mxu0 %v1505_v27  ;;  %v1508_v29 = vld [vmem:[%s2015_s16 + $0x8] sm:$0xff]   ;;  %s728_s24 = scalar_lea.vmem [#allocation10], %s1177_s23  ;;  %v2068_v9 = vshrl.u32 (!%p1178_p11), %v767_v7, 7 }
  0xa3   : > { %1281 = vmatprep.subr.bf16.mxu0 %v1498_v20  ;;  %1304 = vmatpush3.bf16.msra.mxu1 %v1506_v28  ;;  %v1501_v30 = vld [vmem:[%s2017_s14 + $0x20] sm:$0xff]   ;;  %v1510_v31 = vld [vmem:[%s2015_s16 + $0x10] sm:$0xff]   ;;  %v1502_v32 = vld [vmem:[%s2017_s14 + $0x28] sm:$0xff]  }
  0xa4   : > { %1305 = vmatprep.subr.bf16.mxu1 %v1759_v15  ;;  %v1512_v33 = vld [vmem:[%s2015_s16 + $0x18] sm:$0xff]   ;;  %v1503_v34 = vld [vmem:[%s2017_s14 + $0x30] sm:$0xff]   ;;  %v1507_v36 = vld [vmem:[%s2015_s16 + $0x8] sm:$0xff]   ;;  %v769_v12 = vadd.s32 (!%p1178_p11), 8, %v2068_v9  ;;  %v772_v13 = vadd.s32 (!%p1178_p11), 32, %v2068_v9  ;;  %v778_v14 = vadd.s32 (!%p1178_p11), %v2070_v10, %v2068_v9  ;;  %v773_v17 = vadd.s32 (!%p1178_p11), 40, %v2068_v9 }
  0xa5   : > { %642 = vxpose.xlu0.c.b16.cont [2/4] (short) (narrow) %v630_v18, 16  ;;  %v1504_v35 = vld [vmem:[%s2017_s14 + $0x38] sm:$0xff]   ;;  %v1509_v37 = vld [vmem:[%s2015_s16 + $0x10] sm:$0xff]   ;;  %v435_v41 = vld [vmem:[#allocation2] sm:$0xff] }
  0xa6   : > { %1282 = vmatpush3.bf16.msra.mxu0 %v1498_v20  ;;  %v1511_v38 = vld [vmem:[%s2015_s16 + $0x18] sm:$0xff]   ;;  %v437_v40 = vld [vmem:[#allocation2 + $0x10] sm:$0xff]  ;;  %v436_v46 = vld [vmem:[#allocation2 + $0x8] sm:$0xff]  ;;  %v782_v18 = vadd.s32 (!%p1178_p11), %v2070_v10, %v772_v13  ;;  %vm786_vm2 = vcmp.lt.s32.totalorder (!%p1178_p11), %v778_v14, 160 }
  0xa7   : > { %1283 = vmatprep.subr.bf16.mxu0 %v1499_v23  ;;  %1306 = vmatpush3.bf16.msra.mxu1 %v1508_v29  ;;  %v438_v43 = vld [vmem:[#allocation2 + $0x18] sm:$0xff]  ;;  %v441_v52 = vld [vmem:[#allocation2 + $0x30] sm:$0xff]  ;;  %v439_v53 = vld [vmem:[#allocation2 + $0x20] sm:$0xff] }
  0xa8   : > { %1307 = vmatprep.subr.bf16.mxu1 %v1759_v15  ;;  %v442_v55 = vld [vmem:[#allocation2 + $0x38] sm:$0xff]  ;;  %v440_v58 = vld [vmem:[#allocation2 + $0x28] sm:$0xff]  ;;  %v729_v0 = vld [vmem:[%s728_s24] sm:$0xff]  ;;  %vm790_vm4 = vcmp.lt.s32.totalorder (!%p1178_p11), %v782_v18, 160 }
  0xa9   : > { %643 = vxpose.xlu0.c.b16.cont [3/4] (short) (narrow) %v631_v22, 16  ;;  %v1513_v6 = vld [vmem:[#allocation7] sm:$0xff] (!%p1178_p11)   ;;  %v1514_v8 = vld [vmem:[#allocation7 + $0x8] sm:$0xff] (!%p1178_p11)   ;;  %v1515_v11 = vld [vmem:[#allocation7 + $0x10] sm:$0xff] (!%p1178_p11)  }
  0xaa   : > { %1284 = vmatpush3.bf16.msra.mxu0 %v1499_v23  ;;  %v1516_v16 = vld [vmem:[#allocation7 + $0x18] sm:$0xff] (!%p1178_p11)   ;;  %v1179_v21 = vld [vmem:[%s2258_s17] ss:$0 sm:$0xff] (!%p1178_p11) }
  0xab   : > { %1285 = vmatprep.subr.bf16.mxu0 %v1500_v25  ;;  %1308 = vmatpush3.bf16.msra.mxu1 %v1510_v31  ;;  %v1517_v31 = vld [vmem:[#allocation7 + $0x20] sm:$0xff] (!%p1178_p11)  }
  0xac   : > { %1309 = vmatprep.subr.bf16.mxu1 %v1759_v15  ;;  %v779_v15 = vadd.s32 (!%p1178_p11), %v2070_v10, %v769_v12 }
  0xad   : > { %644 = vxpose.xlu0.c.b16.end [4/4] (short) (narrow) %v632_v26, 16  ;;  %v783_v26 = vadd.s32 (!%p1178_p11), %v2070_v10, %v773_v17 }
  0xae   : > { %1286 = vmatpush3.bf16.msra.mxu0 %v1500_v25  ;;  %vm787_vm3 = vcmp.lt.s32.totalorder (!%p1178_p11), %v779_v15, 160 }
  0xaf   : > { %1287 = vmatprep.subr.bf16.mxu0 %v1501_v30  ;;  %1310 = vmatpush3.bf16.msra.mxu1 %v1512_v33  ;;  %vm791_vm5 = vcmp.lt.s32.totalorder (!%p1178_p11), %v783_v26, 160  ;;  %vm1189_vm6 = vmpackc.low (!%p1178_p11), %vm787_vm3, %vm786_vm2 }
  0xb0   : > { %1339 = vmatprep.subr.bf16.mxu1 (!%p1178_p11), %v1513_v6  ;;  %vm1195_vm7 = vmpackc.low (!%p1178_p11), %vm791_vm5, %vm790_vm4 }
  0xb2   : > { %1288 = vmatpush3.bf16.msra.mxu0 %v1501_v30 }
  0xb3   : > { %1289 = vmatprep.subr.bf16.mxu0 %v1502_v32 }
  0xb6   : > { %1290 = vmatpush3.bf16.msra.mxu0 %v1502_v32 }
  0xb7   : > { %1291 = vmatprep.subr.bf16.mxu0 %v1503_v34 }
  0xba   : > { %1292 = vmatpush3.bf16.msra.mxu0 %v1503_v34 }
  0xbb   : > { %1293 = vmatprep.subr.bf16.mxu0 %v1504_v35 }
  0xbe   : > { %1294 = vmatpush3.bf16.msra.mxu0 %v1504_v35 }
  0xbf   : > { %1315 = vmatprep.subr.bf16.mxu0 (!%p1178_p11), %v1513_v6 }
  0xc1   : > { %1296 = vmatmul.mubr.bf16.vlgmr.msra.gmra.mrb[0].mxu0 %v1507_v36  ;;  %v1518_v36 = vld [vmem:[#allocation7 + $0x28] sm:$0xff] (!%p1178_p11)  }
  0xc2   : > { %1299 = vmatprep.mubr.bf16.mxu0 %v1509_v37  ;;  %1316 = vmatpush3.bf16.msra.mxu0 (!%p1178_p11), %v1513_v6 }
  0xc3   : > { %1317 = vmatprep.subr.bf16.mxu0 (!%p1178_p11), %v1514_v8 }
  0xc6   : > { %1318 = vmatpush3.bf16.msra.mxu0 (!%p1178_p11), %v1514_v8 }
  0xc7   : > { %1319 = vmatprep.subr.bf16.mxu0 (!%p1178_p11), %v1515_v11 }
  0xc9   : > { %1300 = vmatmul.mubr.bf16.gmra.mrb[4].mxu0 %v1511_v38 }
  0xca   : > { %1320 = vmatpush3.bf16.msra.mxu0 (!%p1178_p11), %v1515_v11 }
  0xcb   : > { %1321 = vmatprep.subr.bf16.mxu0 (!%p1178_p11), %v1516_v16 }
  0xce   : > { %1322 = vmatpush3.bf16.msra.mxu0 (!%p1178_p11), %v1516_v16 }
  0xcf   : > { %1323 = vmatprep.subr.bf16.mxu0 (!%p1178_p11), %v1517_v31 }
  0xd2   : > { %1324 = vmatpush3.bf16.msra.mxu0 (!%p1178_p11), %v1517_v31 }
  0xd3   : > { %1325 = vmatprep.subr.bf16.mxu0 (!%p1178_p11), %v1518_v36 }
  0xd6   : > { %1326 = vmatpush3.bf16.msra.mxu0 (!%p1178_p11), %v1518_v36 }
 0x107   : > { %v649_v39 = vpop.trf.xlu0 }
 0x108   : > { %1312 = vmatmul.mubr.msk.bf16.vlgmr.msra.gmra.mrb[0].mxu1 %vm681_vm1, %v649_v39  ;;  %v770_v39 = vadd.s32 (!%p1178_p11), 16, %v2068_v9 }
 0x109   : > { %1347 = vmatpush3.bf16.msra.mxu1 (!%p1178_p11), %v1513_v6 }
 0x10a   : > { %1340 = vmatprep.subr.bf16.mxu1 (!%p1178_p11), %v1514_v8 }
 0x10d   : > { %1348 = vmatpush3.bf16.msra.mxu1 (!%p1178_p11), %v1514_v8 }
 0x10e   : > { %1341 = vmatprep.subr.bf16.mxu1 (!%p1178_p11), %v1515_v11 }
 0x111   : > { %1349 = vmatpush3.bf16.msra.mxu1 (!%p1178_p11), %v1515_v11 }
 0x112   : > { %1342 = vmatprep.subr.bf16.mxu1 (!%p1178_p11), %v1516_v16 }
 0x115   : > { %1350 = vmatpush3.bf16.msra.mxu1 (!%p1178_p11), %v1516_v16 }
 0x116   : > { %1343 = vmatprep.subr.bf16.mxu1 (!%p1178_p11), %v1517_v31 }
 0x119   : > { %1351 = vmatpush3.bf16.msra.mxu1 (!%p1178_p11), %v1517_v31 }
 0x11a   : > { %1344 = vmatprep.subr.bf16.mxu1 (!%p1178_p11), %v1518_v36 }
 0x11d   : > { %1352 = vmatpush3.bf16.msra.mxu1 (!%p1178_p11), %v1518_v36 }
 0x194   : > { %v1297_v42 = vpop.f32.mrb[0].mxu0 }
 0x195   : > { %v606_v44 = vadd.f32 %v1297_v42, %v437_v40  ;;  %v573_v45 = vpop.f32.mrb[1].mxu0  ;;  %v771_v40 = vadd.s32 (!%p1178_p11), 24, %v2068_v9 }
 0x196   : > { %v604_v47 = vadd.f32 %v573_v45, %v435_v41  ;;  %v1298_v48 = vpop.f32.mrb[2].mxu0  ;;  %v775_v45 = vadd.s32 (!%p1178_p11), 56, %v2068_v9 }
 0x197   : > { %614 = vst [vmem:[#allocation2 + $0x10] sm:$0xff] %v606_v44  ;;  %v607_v49 = vadd.f32 %v1298_v48, %v438_v43  ;;  %v576_v50 = vpop.f32.mrb[3].mxu0  ;;  %v1519_v43 = vld [vmem:[#allocation7 + $0x30] sm:$0xff] (!%p1178_p11)   ;;  %v774_v44 = vadd.s32 (!%p1178_p11), 48, %v2068_v9 }
 0x198   : > { %612 = vst [vmem:[#allocation2] sm:$0xff] %v604_v47  ;;  %v605_v51 = vadd.f32 %v576_v50, %v436_v46  ;;  %v780_v50 = vadd.s32 (!%p1178_p11), %v2070_v10, %v770_v39  ;;  %1327 = vmatprep.subr.bf16.mxu0 (!%p1178_p11), %v1519_v43  ;;  %1345 = vmatprep.subr.bf16.mxu1 (!%p1178_p11), %v1519_v43 }
 0x199   : > { %615 = vst [vmem:[#allocation2 + $0x18] sm:$0xff] %v607_v49  ;;  %1328 = vmatpush3.bf16.msra.mxu0 (!%p1178_p11), %v1519_v43  ;;  %1353 = vmatpush3.bf16.msra.mxu1 (!%p1178_p11), %v1519_v43 }
 0x19a   : > { %613 = vst [vmem:[#allocation2 + $0x8] sm:$0xff] %v605_v51  ;;  %v781_v51 = vadd.s32 (!%p1178_p11), %v2070_v10, %v771_v40  ;;  %vm788_vm8 = vcmp.lt.s32.totalorder (!%p1178_p11), %v780_v50, 160 }
 0x19c   : > { %v1301_v54 = vpop.f32.mrb[4].mxu0  ;;  %vm789_vm9 = vcmp.lt.s32.totalorder (!%p1178_p11), %v781_v51, 160 }
 0x19d   : > { %v610_v56 = vadd.f32 %v1301_v54, %v441_v52  ;;  %v589_v57 = vpop.f32.mrb[5].mxu0  ;;  %v1520_v52 = vld [vmem:[#allocation7 + $0x38] sm:$0xff] (!%p1178_p11)   ;;  %v785_v54 = vadd.s32 (!%p1178_p11), %v2070_v10, %v775_v45  ;;  %vm1192_vm12 = vmpackc.low (!%p1178_p11), %vm789_vm9, %vm788_vm8 }
 0x19e   : > { %v608_v59 = vadd.f32 %v589_v57, %v439_v53  ;;  %v1302_v60 = vpop.f32.mrb[6].mxu0  ;;  %v738_v37 = vld [vmem:[#allocation2 + $0x10] sm:$0xff] (!%p1178_p11)  ;;  %v784_v53 = vadd.s32 (!%p1178_p11), %v2070_v10, %v774_v44  ;;  %1329 = vmatprep.subr.bf16.mxu0 (!%p1178_p11), %v1520_v52  ;;  %1346 = vmatprep.subr.bf16.mxu1 (!%p1178_p11), %v1520_v52 }
 0x19f   : > { %618 = vst [vmem:[#allocation2 + $0x30] sm:$0xff] %v610_v56  ;;  %v611_v61 = vadd.f32 %v1302_v60, %v442_v55  ;;  %v592_v62 = vpop.f32.mrb[7].mxu0  ;;  %v736_v19 = vld [vmem:[#allocation2] sm:$0xff] (!%p1178_p11)  ;;  %v753_v46 = vadd.f32 (!%p1178_p11), %v1179_v21, %v738_v37  ;;  %vm793_vm11 = vcmp.lt.s32.totalorder (!%p1178_p11), %v785_v54, 160  ;;  %1330 = vmatpush3.bf16.msra.mxu0 (!%p1178_p11), %v1520_v52  ;;  %1354 = vmatpush3.bf16.msra.mxu1 (!%p1178_p11), %v1520_v52 }
 0x1a0   : > { %616 = vst [vmem:[#allocation2 + $0x20] sm:$0xff] %v608_v59  ;;  %v609_v63 = vadd.f32 %v592_v62, %v440_v58  ;;  %v751_v22 = vadd.f32 (!%p1178_p11), %v1179_v21, %v736_v19  ;;  %v739_v38 = vld [vmem:[#allocation2 + $0x18] sm:$0xff] (!%p1178_p11)  ;;  %vm792_vm10 = vcmp.lt.s32.totalorder (!%p1178_p11), %v784_v53, 160 }
 0x1a1   : > { %619 = vst [vmem:[#allocation2 + $0x38] sm:$0xff] %v611_v61  ;;  %v737_v20 = vld [vmem:[#allocation2 + $0x8] sm:$0xff] (!%p1178_p11)  ;;  %v754_v47 = vadd.f32 (!%p1178_p11), %v1179_v21, %v739_v38  ;;  %v761_v55 = vmax.f32 (!%p1178_p11), %v753_v46, 0.0  ;;  %vm1198_vm13 = vmpackc.low (!%p1178_p11), %vm793_vm11, %vm792_vm10 }
 0x1a2   : > { %617 = vst [vmem:[#allocation2 + $0x28] sm:$0xff] %v609_v63  ;;  %v752_v23 = vadd.f32 (!%p1178_p11), %v1179_v21, %v737_v20  ;;  %v759_v29 = vmax.f32 (!%p1178_p11), %v751_v22, 0.0 }
 0x1a3   : > { %v762_v56 = vmax.f32 (!%p1178_p11), %v754_v47, 0.0 }
 0x1a4   : > { %v760_v30 = vmax.f32 (!%p1178_p11), %v752_v23, 0.0 }
 0x1a5   : > { %v1193_v59 = vpack.c.bf16 (!%p1178_p11), %v762_v56, %v761_v55 }
 0x1a6   : > { %v1190_v34 = vpack.c.bf16 (!%p1178_p11), %v760_v30, %v759_v29  ;;  %v742_v41 = vld [vmem:[#allocation2 + $0x30] sm:$0xff] (!%p1178_p11) }
 0x1a7   : > { %v740_v24 = vld [vmem:[#allocation2 + $0x20] sm:$0xff] (!%p1178_p11)  ;;  %v757_v48 = vadd.f32 (!%p1178_p11), %v1179_v21, %v742_v41 }
 0x1a8   : > { %v755_v27 = vadd.f32 (!%p1178_p11), %v1179_v21, %v740_v24  ;;  %1331 = vmatprep.mubr.msk.bf16.mxu0 (!%p1178_p11), %vm1189_vm6, %v1190_v34  ;;  %v743_v42 = vld [vmem:[#allocation2 + $0x38] sm:$0xff] (!%p1178_p11) }
 0x1a9   : > { %v741_v25 = vld [vmem:[#allocation2 + $0x28] sm:$0xff] (!%p1178_p11)  ;;  %v758_v49 = vadd.f32 (!%p1178_p11), %v1179_v21, %v743_v42  ;;  %v765_v57 = vmax.f32 (!%p1178_p11), %v757_v48, 0.0  ;;  %1332 = vmatmul.mubr.msk.bf16.vlgmr.msra.gmra.mrb[0].mxu0 (!%p1178_p11), %vm1192_vm12, %v1193_v59 }
 0x1aa   : > { %v756_v28 = vadd.f32 (!%p1178_p11), %v1179_v21, %v741_v25  ;;  %v763_v32 = vmax.f32 (!%p1178_p11), %v755_v27, 0.0 }
 0x1ab   : > { %v766_v58 = vmax.f32 (!%p1178_p11), %v758_v49, 0.0 }
 0x1ac   : > { %v764_v33 = vmax.f32 (!%p1178_p11), %v756_v28, 0.0 }
 0x1ad   : > { %v1199_v60 = vpack.c.bf16 (!%p1178_p11), %v766_v58, %v765_v57 }
 0x1ae   : > { %v1196_v35 = vpack.c.bf16 (!%p1178_p11), %v764_v33, %v763_v32 }
 0x1b0   : > { %1335 = vmatprep.mubr.msk.bf16.mxu1 (!%p1178_p11), %vm1195_vm7, %v1196_v35 }
 0x1d8   : > { %735 = sbr.rel (%p1178_p11) target bundleno = 696 (0x2b8), region = 101 }
 0x1db   : > { %v719_v1 = vpop.f32.mrb[0].mxu1 }
 0x1dc   : > { %v730_v2 = vadd.f32 %v729_v0, %v719_v1  ;;  %v1313_v3 = vpop.f32.mrb[1].mxu1 }
 0x1dd   : > { %v722_v4 = vpop.f32.mrb[2].mxu1 }
 0x1de   : > { %731 = vst [vmem:[%s728_s24] sm:$0xff] %v730_v2  ;;  %v1314_v5 = vpop.f32.mrb[3].mxu1  ;;  %1336 = vmatmul.mubr.msk.bf16.vlgmr.msra.gmra.mrb[0].mxu1 (!%p1178_p11), %vm1198_vm13, %v1199_v60 }
 0x27c   : > { %v1333_v61 = vpop.f32.mrb[0].mxu0 }
 0x27d   : > { %v904_v63 = vpop.f32.mrb[1].mxu0 }
 0x27e   : > { %v1334_v1 = vpop.f32.mrb[2].mxu0 }
 0x27f   : > { %v1235_v3 = vpack.c.bf16 %v1334_v1, %v1333_v61  ;;  %v907_v5 = vpop.f32.mrb[3].mxu0 }
 0x280   : > { %v1230_v7 = vpack.c.bf16 %v907_v5, %v904_v63 }
 0x281   : > { %1247 = vst [vmem:[%s2038_s12 + $0x8] sm:$0xff] %v1235_v3  }
 0x282   : > { %1231 = vst [vmem:[%s2038_s12] sm:$0xff] %v1230_v7  }
 0x2b1   : > { %v1337_v62 = vpop.f32.mrb[0].mxu1 }
 0x2b2   : > { %v920_v0 = vpop.f32.mrb[1].mxu1 }
 0x2b3   : > { %v1338_v2 = vpop.f32.mrb[2].mxu1 }
 0x2b4   : > { %v1245_v4 = vpack.c.bf16 %v1338_v2, %v1337_v62  ;;  %v923_v6 = vpop.f32.mrb[3].mxu1 }
 0x2b5   : > { %v1240_v8 = vpack.c.bf16 %v923_v6, %v920_v0 }
 0x2b6   : > { %1249 = vst [vmem:[%s2038_s12 + $0x18] sm:$0xff] %v1245_v4  }
 0x2b7   : > { %1248 = vst [vmem:[%s2038_s12 + $0x10] sm:$0xff] %v1240_v8  }
 0x2b8 PF: > { %s2259_s16 = sld [smem:[#allocation24_spill]]  ;;  %s1226_s3 = sshll.u32 %s1737_s30, 9 }
 0x2b9   : > { %s2260_s6 = sld [smem:[#allocation28_spill]]  ;;  %s989_s15 = sshll.u32 %s2038_s12, 4  ;;  %s2103_s15 = int_to_ptr.vmem [resolvable:$true] %s989_s15 }
 0x2ba   : > { %s2107_s2 = scalar_lea.sflag [#allocation6], %s401_s27  ;;  %s1577_s5 = scalar_lea.vmem %s2103_s15, 512 }
 0x2bb   : > { %p1578_p1 = scmp.ne.s32.totalorder %s2103_s15, %s1577_s5  ;;  %s1761_s30 = smov [#allocation9]  }
 0x2bc   : > { %s1581_s21 = sshll.u32 %s1761_s30, 4  ;;  %s1582_s21 = int_to_ptr.vmem [resolvable:$false] %s1581_s21 }
 0x2bd   : > { %s1583_s18 = scalar_lea.vmem %s1582_s21, 1024  ;;  %p1584_p0 = scmp.lt.s32.totalorder %s2103_s15, %s1582_s21 }
 0x2be   : > { %p2261_p8 = scmp.ne.s32.totalorder %s2259_s16, 0  ;;  %p1585_p12 = scmp.lt.s32.totalorder %s1583_s18, %s1577_s5 }
 0x2bf   : > { %s2100_s13 = scalar_lea.hbm %s2260_s6, %s1226_s3 }
 0x2c0   : > { %p1579_p3 = pnand %p1578_p1, %p2261_p8  ;;  %p1586_p5 = por %p1585_p12, %p1584_p0 }
 0x2c2   : > { %p1580_p10 = pneg %p1579_p3 }
 0x2c4   : > { %p1587_p7 = pnand %p1586_p5, %p1580_p10 }
 0x2c6   : > { %1590 = shalt.err (!%p1587_p7)
}
 0x2c7   : > { %s1591_s27 = scalar_lea.hbm %s2100_s13, 512  ;;  %s1595_s23 = scalar_lea.hbm %s2260_s6, 2048 }
 0x2c8   : > { %p1592_p9 = scmp.ne.s32.totalorder %s2100_s13, %s1591_s27  ;;  %p1596_p4 = scmp.lt.u32.totalorder %s2100_s13, %s2260_s6 }
 0x2c9   : > { %p1597_p6 = scmp.lt.u32.totalorder %s1595_s23, %s1591_s27  ;;  %p1599_p1 = scmp.lt.u32.totalorder %s1591_s27, %s2100_s13 }
 0x2ca   : > { %p1593_p13 = pnand %p1592_p9, %p2261_p8 }
 0x2cb   : > { %p1598_p11 = por %p1597_p6, %p1596_p4 }
 0x2cc   : > { %p1594_p2 = pneg %p1593_p13 }
 0x2cd   : > { %p1600_p3 = por %p1599_p1, %p1598_p11 }
 0x2cf   : > { %p1601_p10 = pnand %p1600_p3, %p1594_p2 }
 0x2d1   : > { %1604 = shalt.err (!%p1601_p10)
}
 0x2d2   : > { %s1762_s29 = smov 64   ;;  %s2262_s11 = sld [smem:[#allocation23_spill]] }
 0x2d3   : > { %s1763_s17 = smov 4   ;;  %s1764_s3 = smov [#allocation10]  }
 0x2d4   : > { %1361 = dma.vmem_to_hbm [thread:$0]  (%p2261_p8), %s2103_s15, 512, %s2100_s13, %s2107_s2, %s1762_s29, %s1762_s29, %s1763_s17  }
 0x2d5   : > { %s1003_s14 = sshll.u32 %s1764_s3, 4  ;;  %s1004_s14 = int_to_ptr.vmem [resolvable:$true] %s1003_s14 }
 0x2d6   : > { %s1605_s20 = scalar_lea.vmem %s1004_s14, 256  ;;  %p1612_p9 = scmp.lt.s32.totalorder %s1004_s14, %s1004_s14 }
 0x2d7   : > { %p1606_p0 = scmp.ne.s32.totalorder %s1004_s14, %s1605_s20  ;;  %p1613_p13 = scmp.lt.s32.totalorder %s1605_s20, %s1605_s20 }
 0x2d8   : > { %p2263_p12 = scmp.ne.s32.totalorder %s2262_s11, 0 }
 0x2d9   : > { %p1614_p2 = por %p1613_p13, %p1612_p9 }
 0x2da   : > { %p1607_p5 = pnand %p1606_p0, %p2263_p12 }
 0x2dc   : > { %p1608_p7 = pneg %p1607_p5 }
 0x2de   : > { %p1615_p4 = pnand %p1614_p2, %p1608_p7 }
 0x2e0   : > { %1618 = shalt.err (!%p1615_p4)
}
 0x2e1   : > { %s2264_s21 = sld [smem:[#allocation29_spill]] }
 0x2e7   : > { %s2265_s18 = smov %s2264_s21  ;;  %s1619_s27 = scalar_lea.hbm %s2264_s21, 256 }
 0x2e8   : > { %p1620_p8 = scmp.ne.s32.totalorder %s2265_s18, %s1619_s27  ;;  %p1625_p1 = scmp.lt.u32.totalorder %s1619_s27, %s2265_s18 }
 0x2ea   : > { %p1621_p6 = pnand %p1620_p8, %p2263_p12 }
 0x2ec   : > { %p1622_p11 = pneg %p1621_p6 }
 0x2ee   : > { %p1627_p3 = pnand %p1625_p1, %p1622_p11 }
 0x2f0   : > { %1630 = shalt.err (!%p1627_p3)
}
 0x2f1   : > { %1363 = dma.vmem_to_hbm [thread:$0]  (%p2263_p12), %s1004_s14, 256, %s2265_s18, [#allocation11]  }
 0x2f2   : > { %1692 = dma.done.wait (%p2263_p12), [#allocation11], 256  }
 0x2f3   : > { %1694 = vsyncadd (%p2263_p12), [#allocation11], 4294967040 }
 0x2f4 PF: > { %s2266_s23 = sld [smem:[#allocation16_spill]]  ;;  %s2267_s24 = sld [smem:[#allocation25_spill]] }
 0x2f5   : > { %p1379_p10 = scmp.ge.s32.totalorder %s1749_s9, 2 }
 0x2fa   : > { %s1019_s10 = sand.u32 1, %s2266_s23   ;;  %p2268_p0 = scmp.ne.s32.totalorder %s2267_s24, 0 }
 0x2fb   : > { %s1020_s29 = scalar_lea.sflag [#allocation6], %s1019_s10 }
 0x2fc   : > { %p1372_p5 = pnand %p1379_p10, %p2268_p0 }
 0x2fe   : > { %1696 = dma.done.wait (!%p1372_p5), %s1020_s29, 512  }
 0x2ff   : > { %1698 = vsyncadd (!%p1372_p5), %s1020_s29, 4294966784  ;;  %s25_s9 = sadd.s32 1, %s1749_s9   ;;  %s2270_s11 = sld [smem:[#allocation17_spill]] }
 0x300   : > { %p2158_p7 = scmp.ge.s32.totalorder %s25_s9, 10   ;;  %s2271_s23 = sld [smem:[#allocation22_spill]] }
 0x301   : > { %s2272_s3 = sld [smem:[#allocation20_spill]]  ;;  %s2273_s14 = sld [smem:[#allocation21_spill]] }
 0x302   : > { %s2274_s20 = sld [smem:[#allocation18_spill]]  ;;  %s2275_s5 = sld [smem:[#allocation19_spill]] }
 0x303   : > { %s2276_s21 = smov %s1705_s22  ;;  %s2278_s24 = smov %s1717_s25 }
 0x304   : > { %s2279_s25 = smov %s1721_s26  ;;  %s2281_s27 = smov %s1729_s28 }
 0x305   : > { %s2277_s22 = smov %s2270_s11  ;;  %s2283_s29 = smov %s1741_s7 }
 0x306   : > { %s2284_s30 = smov %s1745_s8  ;;  %24 = sbr.rel (!%p2158_p7) target bundleno = 17 (0x11), region = 162 }
 0x307   : > { %s2280_s26 = smov %s2272_s3  ;;  %s2282_s28 = smov %s2273_s14 }
 0x308   : > { %s2285_s7 = smov %s2274_s20  ;;  %s2286_s8 = smov %s2275_s5 }
 0x30d   :  { %1025 = vsyncpa [#allocation5], 1 }
 0x30e   :  { %1027 = vsyncpa [#allocation5 + $0x1], 1 }
 0x30f   :  { %1028 = vsyncpa [#allocation8], 1 }
 0x310   :  { %1029 = vsyncpa [#allocation6], 1 }
 0x311   :  { %1031 = vsyncpa [#allocation6 + $0x1], 1 }
 0x312   :  { %1032 = vsyncpa [#allocation11], 1 }

</bundles_post_ra>
